<compile_context>
chip_gen: v7x
topology: tpu7x:2x2x1
jax: 0.10.0
libtpu: 0.0.40
codegen_flags: <defaults>
</compile_context>

<pallas_src>
import functools

import jax
import jax.numpy as jnp
from jax import lax
from jax.experimental import pallas as pl
from jax.experimental.pallas import tpu as pltpu

# --- synthetic "conf" -------------------------------------------------------
RESIDUAL_FILTERS = 4
RESIDUAL_KERNEL_SIZE = 3
RESIDUAL_STRIDE = 1
RESIDUAL_PADDING = 1
BN_EPS = 1e-5

assert RESIDUAL_STRIDE == 1 and RESIDUAL_PADDING == (RESIDUAL_KERNEL_SIZE - 1) // 2, (
    "kernel assumes the usual residual-block 'same' convolution")


# --- roll-direction probe ---------------------------------------------------
_ROLL_LIKE_JNP = None


def _roll_like_jnp():
    """True iff pltpu.roll(x, s, axis) matches jnp.roll(x, s, axis) on this backend.

    Resolved once with a tiny probe kernel and cached as a Python bool, so the
    in-kernel tap shifts are rotation-direction proof.
    """
    global _ROLL_LIKE_JNP
    if _ROLL_LIKE_JNP is None:
        def probe(x_ref, o_ref):
            o_ref[...] = pltpu.roll(x_ref[...], 1, 1)

        x = jnp.tile(jnp.arange(128, dtype=jnp.float32)[None, :], (8, 1))
        y = pl.pallas_call(
            probe, out_shape=jax.ShapeDtypeStruct((8, 128), jnp.float32))(x)
        # jnp.roll semantics: out[:, 0] == in[:, 127] == 127.
        _ROLL_LIKE_JNP = bool(float(y[0, 0]) == 127.0)
    return _ROLL_LIKE_JNP


# --- fused Pallas kernel ----------------------------------------------------
def _residual_block_kernel(H, W, roll_like_jnp,
                           x_ref, w1_ref, w2_ref, bn_ref, o_ref, b_ref):
    """Fully fused ResidualBlock forward on one lane-dense (C, S=N*H*W) slab.

    x_ref : (C, S)  f32 VMEM   input activation (also the residual)
    w?_ref: (C, 3*K*K*C) bf16  K-stacked conv weights [w_hi | w_lo | w_hi]
    bn_ref: (4*C,)  f32 SMEM   [gamma1, beta1, gamma2, beta2]
    o_ref : (C, S)  f32 VMEM   output
    b_ref : (3*K*K*C, S) f32   VMEM scratch: K-stacked im2col operand [p ; p ; p_lo]
    """
    C, S = x_ref.shape
    kkc = b_ref.shape[0] // 3          # K*K*C rows per hi/lo block
    inv_s = 1.0 / S

    # ---- shared tap machinery (masks realize the zero "same" padding) ------
    lane = lax.broadcasted_iota(jnp.int32, (C, S), 1)
    w_pos = lane % W                   # w index inside a row
    h_pos = (lane // W) % H            # h index inside a sample
    valid_w = {-1: w_pos >= 1, 0: None, 1: w_pos <= W - 2}
    valid_h = {-1: h_pos >= 1, 0: None, 1: h_pos <= H - 2}

    def shift_lanes(a, d):
        # out[:, s] == a[:, (s + d) % S]; wrapped positions are masked by the caller.
        if d == 0:
            return a
        amount = (-d) % S if roll_like_jnp else d % S
        return pltpu.roll(a, amount, 1)

    def tap_mask(dh, dw):
        ms = [m for m in (valid_h[dh], valid_w[dw]) if m is not None]
        if not ms:
            return None
        return ms[0] & ms[1] if len(ms) == 2 else ms[0]

    def bn_param(base):
        # Materialize C SMEM scalars as a (C, 1) per-channel column.
        ch = lax.broadcasted_iota(jnp.int32, (C, 1), 0)
        v = jnp.zeros((C, 1), jnp.float32)
        for c in range(C):
            v = jnp.where(ch == c, bn_ref[base + c], v)
        return v

    def conv3x3_bn(a, w_stacked, gamma, beta):
        # Build the K-stacked im2col operand [p ; p ; p_lo] in the VMEM scratch
        # (never in HBM).  Every 4-row store lands inside a single (8,128) tile.
        taps = [(dh, dw) for dh in (-1, 0, 1) for dw in (-1, 0, 1)]
        for idx, (dh, dw) in enumerate(taps):
            tap = shift_lanes(a, dh * W + dw)
            m = tap_mask(dh, dw)
            if m is not None:
                tap = jnp.where(m, tap, 0.0)
            lo = tap - tap.astype(jnp.bfloat16).astype(jnp.float32)
            r = idx * C
            b_ref[r:r + C, :] = tap                      # block 0: pairs with w_hi
            b_ref[kkc + r:kkc + r + C, :] = tap          # block 1: pairs with w_lo
            b_ref[2 * kkc + r:2 * kkc + r + C, :] = lo   # block 2: pairs with w_hi
        # Single MXU contraction (K = 3*K*K*C = 108: one pass on v5e/v6e/v7x).
        acc = jnp.dot(w_stacked, b_ref[...].astype(jnp.bfloat16),
                      preferred_element_type=jnp.float32)        # (C, S) f32
        # conv bias omitted: exactly cancelled by the batch-mean subtraction below.
        # BatchNorm2d, training-mode batch statistics over (N, H, W) == the lane axis.
        mean = jnp.sum(acc, axis=1, keepdims=True) * inv_s
        ex2 = jnp.sum(acc * acc, axis=1, keepdims=True) * inv_s
        var = jnp.maximum(ex2 - mean * mean, 0.0)        # one-pass var can dip < 0
        scale = gamma * lax.rsqrt(var + BN_EPS)
        shift = beta - mean * scale
        return acc * scale + shift

    x = x_ref[...]                                       # residual, stays in VMEM
    y1 = jnp.maximum(conv3x3_bn(x, w1_ref[...], bn_param(0), bn_param(C)), 0.0)
    y2 = conv3x3_bn(y1, w2_ref[...], bn_param(2 * C), bn_param(3 * C))
    o_ref[...] = jnp.maximum(y2 + x, 0.0)
    # TODO(synk): BatchNorm running_mean/running_var buffer updates (training-time side
    # effect that does not change this forward output) are not materialized.


# --- wrapper ----------------------------------------------------------------
def _stack_conv_weight(w):
    """OIHW -> (Cout, K*K*Cin) tap-major/channel-minor, hi/lo K-stacked to bf16."""
    c_out, c_in, k, _ = w.shape
    w_t = jnp.transpose(w, (0, 2, 3, 1)).reshape(c_out, k * k * c_in).astype(jnp.float32)
    w_hi = w_t.astype(jnp.bfloat16)
    w_lo = (w_t - w_hi.astype(jnp.float32)).astype(jnp.bfloat16)
    return jnp.concatenate([w_hi, w_lo, w_hi], axis=1)   # (Cout, 3*K*K*Cin)


@jax.jit
def residual_block(x_nchw, params):
    """Forward pass of ResidualBlock. Input/output are NCHW float32 (like PyTorch)."""
    N, C, H, W = x_nchw.shape
    S = N * H * W
    K = RESIDUAL_KERNEL_SIZE

    # Channels-major layout: flat spatial axis S = N*H*W (multiple of 128) on lanes.
    x_t = jnp.transpose(x_nchw.astype(jnp.float32), (1, 0, 2, 3)).reshape(C, S)

    w1 = _stack_conv_weight(params["w1"])
    w2 = _stack_conv_weight(params["w2"])
    # params["b1"] / params["b2"] are intentionally unused: a conv bias is exactly
    # cancelled by the batch-statistics BatchNorm that follows each conv.
    bn = jnp.concatenate(
        [params["g1"], params["be1"], params["g2"], params["be2"]]).astype(jnp.float32)

    vmem = pl.BlockSpec(memory_space=pltpu.MemorySpace.VMEM)
    smem = pl.BlockSpec(memory_space=pltpu.MemorySpace.SMEM)
    y_t = pl.pallas_call(
        functools.partial(_residual_block_kernel, H, W, _roll_like_jnp()),
        out_shape=jax.ShapeDtypeStruct((C, S), jnp.float32),
        in_specs=[vmem, vmem, vmem, smem],
        out_specs=vmem,
        scratch_shapes=[pltpu.VMEM((3 * K * K * C, S), jnp.float32)],
    )(x_t, w1, w2, bn)

    return jnp.transpose(y_t.reshape(C, N, H, W), (1, 0, 2, 3))   # -> NCHW


# --- pure-JAX reference (for a self-check) ----------------------------------
def _reference(x, params):
    def conv(h, w, b):
        y = lax.conv_general_dilated(
            h, w, window_strides=(1, 1),
            padding=[(RESIDUAL_PADDING, RESIDUAL_PADDING)] * 2,
            dimension_numbers=("NCHW", "OIHW", "NCHW"),
            precision=lax.Precision.HIGHEST)
        return y + b[None, :, None, None]

    def bn(y, g, be):
        mean = jnp.mean(y, axis=(0, 2, 3), keepdims=True)
        var = jnp.mean((y - mean) ** 2, axis=(0, 2, 3), keepdims=True)
        return ((y - mean) * lax.rsqrt(var + BN_EPS)
                * g[None, :, None, None] + be[None, :, None, None])

    y = jax.nn.relu(bn(conv(x, params["w1"], params["b1"]), params["g1"], params["be1"]))
    y = bn(conv(y, params["w2"], params["b2"]), params["g2"], params["be2"]) + x
    return jax.nn.relu(y)


# --- main -------------------------------------------------------------------
if __name__ == "__main__":
    N, C, H, W = 2, RESIDUAL_FILTERS, 16, 16
    K = RESIDUAL_KERNEL_SIZE

    key = jax.random.PRNGKey(0)
    kx, kw1, kb1, kw2, kb2 = jax.random.split(key, 5)

    fan_in = C * K * K
    bound = (1.0 / fan_in) ** 0.5  # matches PyTorch Conv2d default init range

    params = {
        "w1": jax.random.uniform(kw1, (C, C, K, K), jnp.float32, -bound, bound),
        "b1": jax.random.uniform(kb1, (C,), jnp.float32, -bound, bound),
        "g1": jnp.ones((C,), jnp.float32),
        "be1": jnp.zeros((C,), jnp.float32),
        "w2": jax.random.uniform(kw2, (C, C, K, K), jnp.float32, -bound, bound),
        "b2": jax.random.uniform(kb2, (C,), jnp.float32, -bound, bound),
        "g2": jnp.ones((C,), jnp.float32),
        "be2": jnp.zeros((C,), jnp.float32),
    }

    x = jax.random.normal(kx, (N, C, H, W), jnp.float32)

    _roll_like_jnp()   # resolve the hardware roll convention before tracing the kernel

    out = jax.block_until_ready(residual_block(x, params))
    assert out.shape == (N, C, H, W) and out.dtype == jnp.float32

    ref = _reference(x, params)
    max_err = float(jnp.max(jnp.abs(out - ref)))
    # 2e-3 budget: the K-stacked bf16 hi/lo contraction leaves ~1e-4-level error through
    # the two BN stages; the reference is exact f32 (Precision.HIGHEST) incl. conv bias.
    assert jnp.allclose(out, ref, atol=2e-3, rtol=2e-3), f"max abs err={max_err}"

    print("KERNEL_OK")
</pallas_src>

<mosaic_0001>
module attributes {stable_mosaic.version = 11 : i64} {
  func.func @probe(%arg0: memref<8x128xf32, #tpu.memory_space<vmem>>, %arg1: memref<8x128xf32, #tpu.memory_space<vmem>>) attributes {dimension_semantics = [], scalar_prefetch = 0 : i64, scratch_operands = 0 : i64, tpu.core_type = #tpu.core_type<tc>} {
    %c0 = arith.constant 0 : index
    %c0_0 = arith.constant 0 : index
    %0 = vector.load %arg0[%c0, %c0_0] : memref<8x128xf32, #tpu.memory_space<vmem>>, vector<8x128xf32>
    %c1_i32 = arith.constant 1 : i32
    %1 = tpu.dynamic_rotate %0 by %c1_i32 dim 1 : vector<8x128xf32>, i32 -> vector<8x128xf32>
    %c0_1 = arith.constant 0 : index
    %c0_2 = arith.constant 0 : index
    %2 = vector.load %arg1[%c0_1, %c0_2] : memref<8x128xf32, #tpu.memory_space<vmem>>, vector<8x128xf32>
    tpu.vector_store %arg1[%c0_1, %c0_2], %1 {strides = array<i32>} : memref<8x128xf32, #tpu.memory_space<vmem>>, vector<8x128xf32>,
    return
  }
}

</mosaic_0001>

<bundles_post_ra>
// kernel: tpu_custom_call.1
= control target key start
LH: loop header
LB: loop body
LE: loop exit
PB: predicated region body
PF: predicated region fallthrough
CT: control target
= control target key end

     0   :  { %6 = vsyncpa [#allocation3], 0  ;;  %s128_s0 = inlined_call_operand.hbm [shape: f32[8,128], index: 0, kind: input, shape index: {}]   ;;  %s129_s1 = inlined_call_operand.hbm [shape: f32[8,128], index: 1, kind: output, shape index: {}]  }
   0x1   :  { %7 = vsyncpa [#allocation4], 0  ;;  %s91_s6 = smov [#allocation2]   ;;  %s43_s10 = scalar_lea.hbm %s128_s0, 128 }
   0x2   :  { %s14_s7 = sshll.u32 %s91_s6, 4  ;;  %p44_p0 = scmp.ne.s32.totalorder %s128_s0, %s43_s10  ;;  %s15_s7 = int_to_ptr.vmem [resolvable:$true] %s14_s7 }
   0x3   :  { %p47_p1 = scmp.lt.u32.totalorder %s43_s10, %s128_s0 }
   0x5   :  { %p49_p2 = pnand %p47_p1, %p44_p0 }
   0x7   :  { %52 = shalt.err (!%p49_p2)
}
   0x8   :  { %s53_s15 = scalar_lea.vmem %s15_s7, 128  ;;  %p58_p4 = scmp.lt.s32.totalorder %s15_s7, %s15_s7 }
   0x9   :  { %p54_p3 = scmp.ne.s32.totalorder %s15_s7, %s53_s15  ;;  %p59_p5 = scmp.lt.s32.totalorder %s53_s15, %s53_s15 }
   0xb   :  { %p60_p6 = por %p59_p5, %p58_p4 }
   0xd   :  { %p61_p7 = pnand %p60_p6, %p54_p3 }
   0xf   :  { %64 = shalt.err (!%p61_p7)
}
  0x10   :  { %17 = dma.hbm_to_vmem [thread:$0]  %s128_s0, 128, %s15_s7, [#allocation3]  }
  0x11   :  { %87 = dma.done.wait [#allocation3], 128  }
  0x12   :  { %88 = vsyncadd [#allocation3], 4294967168  ;;  %v21_v0 = vld [vmem:[#allocation2] sm:$0xff]  ;;  %s92_s18 = smov 1   ;;  %s93_s19 = smov [#allocation5]  }
  0x13   :  { %22 = vrot.lane.b32.xlu0 %v21_v0, %s92_s18  ;;  %s31_s20 = sshll.u32 %s93_s19, 4  ;;  %s32_s20 = int_to_ptr.vmem [resolvable:$true] %s31_s20 }
  0x14   :  { %s65_s21 = scalar_lea.vmem %s32_s20, 128  ;;  %p70_p9 = scmp.lt.s32.totalorder %s32_s20, %s32_s20 }
  0x15   :  { %p66_p8 = scmp.ne.s32.totalorder %s32_s20, %s65_s21  ;;  %p71_p10 = scmp.lt.s32.totalorder %s65_s21, %s65_s21 }
  0x17   :  { %p72_p11 = por %p71_p10, %p70_p9 }
  0x19   :  { %p73_p12 = pnand %p72_p11, %p66_p8 }
  0x85   :  { %v23_v1 = vpop.permute.xlu0 %22 }
  0x86   :  { %24 = vst [vmem:[#allocation5] sm:$0xff] %v23_v1 }
  0x87   :  { %76 = shalt.err (!%p73_p12)
}
  0x88   :  { %s77_s0 = scalar_lea.hbm %s129_s1, 128 }
  0x89   :  { %p78_p13 = scmp.ne.s32.totalorder %s129_s1, %s77_s0  ;;  %p81_p0 = scmp.lt.u32.totalorder %s77_s0, %s129_s1 }
  0x8b   :  { %p83_p1 = pnand %p81_p0, %p78_p13 }
  0x8d   :  { %86 = shalt.err (!%p83_p1)
}
  0x8e   :  { %34 = dma.vmem_to_hbm [thread:$0]  %s32_s20, 128, %s129_s1, [#allocation4]  }
  0x8f   :  { %89 = dma.done.wait [#allocation4], 128  }
  0x90   :  { %90 = vsyncadd [#allocation4], 4294967168 }
  0x91   :  { %38 = vsyncpa [#allocation3], 1 }
  0x92   :  { %39 = vsyncpa [#allocation4], 1 }

</bundles_post_ra>
